<compile_context>
chip_gen: v6e
topology: v6e:2x2x1
jax: 0.10.0
libtpu: 0.0.40
codegen_flags: <defaults>
</compile_context>

<pallas_src>
import jax
import jax.numpy as jnp
from jax.experimental import pallas as pl
from jax.experimental.pallas import tpu as pltpu

_LANES = 1024  # lane-dense slab width (multiple of 128)


def _round_up(n: int, m: int) -> int:
    return ((n + m - 1) // m) * m


def _cdiv(a: int, b: int) -> int:
    return -(-a // b)


def _linreg_kernel(w_ref, b_ref, x_ref, o_ref):
    # w_ref / b_ref: SMEM scalars (shape (1,) f32); x_ref / o_ref: VMEM tiles.
    w = w_ref[0]
    b = b_ref[0]
    o_ref[...] = (w * x_ref[...] + b).astype(o_ref.dtype)


def _device_block_rows_default() -> int:
    """Generation-aware default block rows (f32, 1024 lanes wide)."""
    kind = ""
    try:
        kind = jax.devices()[0].device_kind.lower()
    except Exception:
        pass
    if "v5 lite" in kind or "v5e" in kind:
        return 1024            # 4 MiB block: step overhead already <10% at v5e BW
    if "v6" in kind or "trillium" in kind or "v7" in kind:
        return 2048            # 8 MiB block: cuts per-step overhead to ~3-6%
    return 1024                # conservative default for unknown / older chips


def linear_regression_forward(x: jax.Array, weight: jax.Array, bias: jax.Array,
                              *, block_rows: int | None = None,
                              donate_input: bool = False) -> jax.Array:
    """y = weight * x + bias, computed in a Pallas kernel.

    weight, bias: shape (1,) float32 (matching nn.Parameter(torch.randn(1))).
    x: any-shaped float array (flattened internally; at most lane-granularity
       padding, partial blocks handled by Pallas).
    """
    orig_shape = x.shape
    n = x.size
    dtype = x.dtype
    itemsize = jnp.dtype(dtype).itemsize
    sublane = max(8, 32 // itemsize)      # 8 (f32), 16 (bf16/f16), 32 (int8)

    if block_rows is None:
        block_rows = _device_block_rows_default()
    block_rows = max(sublane, (block_rows // sublane) * sublane)

    # Flatten; pad only up to lane granularity (<= _LANES-1 elements).
    flat = x.reshape(-1)
    rows = max(1, _cdiv(n, _LANES))
    padded_n = rows * _LANES
    if padded_n != n:
        flat = jnp.pad(flat, (0, padded_n - n))
    x2d = flat.reshape(rows, _LANES)

    # Block sizing: partial last block is handled by Pallas (no padding to a
    # block multiple).  Ensure >= 2 grid stripes whenever the input spans more
    # than one minimum tile so both v7x TensorCores stream.
    if rows <= sublane:
        blk = rows                                   # full-dim block (legal even if < sublane)
    else:
        two_stripe = _round_up(_cdiv(rows, 2), sublane)
        blk = max(sublane, min(block_rows, two_stripe))
    grid = (_cdiv(rows, blk),)

    block_bytes = blk * _LANES * itemsize
    # 2 double-buffered slabs per side (in + out) plus headroom.
    vmem_limit = max(32 * 1024 * 1024, 4 * block_bytes + 16 * 1024 * 1024)

    cost = pl.CostEstimate(
        flops=2 * padded_n,
        transcendentals=0,
        bytes_accessed=2 * padded_n * itemsize,
    )

    extra_kwargs = {}
    if donate_input:
        # Alias x2d to the output: safe for an elementwise op, saves HBM
        # footprint when the caller can donate x.
        extra_kwargs["input_output_aliases"] = {2: 0}

    w32 = weight.reshape(-1).astype(jnp.float32)
    b32 = bias.reshape(-1).astype(jnp.float32)

    out2d = pl.pallas_call(
        _linreg_kernel,
        out_shape=jax.ShapeDtypeStruct((rows, _LANES), dtype),
        grid=grid,
        in_specs=[
            pl.BlockSpec(memory_space=pltpu.SMEM),           # weight (1,)
            pl.BlockSpec(memory_space=pltpu.SMEM),           # bias   (1,)
            pl.BlockSpec((blk, _LANES), lambda i: (i, 0)),   # x slab
        ],
        out_specs=pl.BlockSpec((blk, _LANES), lambda i: (i, 0)),
        compiler_params=pltpu.CompilerParams(
            dimension_semantics=("parallel",),
            vmem_limit_bytes=vmem_limit,
        ),
        cost_estimate=cost,
        **extra_kwargs,
    )(w32, b32, x2d)

    if padded_n != n:
        return out2d.reshape(-1)[:n].reshape(orig_shape)
    return out2d.reshape(orig_shape)


if __name__ == "__main__":
    key = jax.random.PRNGKey(0)
    k_w, k_b, k_x = jax.random.split(key, 3)

    # Deterministic "randn"-style parameters, shape (1,) each like the module.
    weight = jax.random.normal(k_w, (1,), dtype=jnp.float32)
    bias = jax.random.normal(k_b, (1,), dtype=jnp.float32)

    # Lane-aligned small input (no padding path).
    x = jax.random.normal(k_x, (2, 4, 16, 16), dtype=jnp.float32)
    y = jax.block_until_ready(linear_regression_forward(x, weight, bias))
    y_ref = weight[0] * x + bias[0]
    assert y.shape == x.shape and y.dtype == x.dtype
    assert jnp.allclose(y, y_ref, atol=1e-6, rtol=1e-6), "mismatch (aligned)"

    # Non-lane-aligned input (tail-pad + single partial block path).
    x2 = jax.random.normal(k_x, (3, 5, 7), dtype=jnp.float32)   # 105 elements
    y2 = jax.block_until_ready(linear_regression_forward(x2, weight, bias))
    assert jnp.allclose(y2, weight[0] * x2 + bias[0], atol=1e-6, rtol=1e-6), \
        "mismatch (tail)"

    # Multi-stripe with a partial last block (rows=10 -> blk=8, grid=2).
    x3 = jax.random.normal(k_x, (10, 1000), dtype=jnp.float32)  # 10000 elements
    y3 = jax.block_until_ready(linear_regression_forward(x3, weight, bias))
    assert jnp.allclose(y3, weight[0] * x3 + bias[0], atol=1e-6, rtol=1e-6), \
        "mismatch (partial block)"

    print("KERNEL_OK")
</pallas_src>

<mosaic_0001>
module attributes {stable_mosaic.version = 11 : i64} {
  func.func @_linreg_kernel(%arg0: i32, %arg1: memref<1xf32, #tpu.memory_space<smem>>, %arg2: memref<1xf32, #tpu.memory_space<smem>>, %arg3: memref<2x1024xf32, #tpu.memory_space<vmem>>, %arg4: memref<2x1024xf32, #tpu.memory_space<vmem>>) attributes {dimension_semantics = [#tpu.dimension_semantics<parallel>], iteration_bounds = array<i64: 1>, scalar_prefetch = 0 : i64, scratch_operands = 0 : i64, tpu.core_type = #tpu.core_type<tc>, window_params = [{transform_indices = @transform_0, window_bounds = array<i64: 1>}, {transform_indices = @transform_1, window_bounds = array<i64: 1>}, {transform_indices = @transform_2, window_bounds = array<i64: 2, 1024>}, {transform_indices = @transform_3, window_bounds = array<i64: 2, 1024>}]} {
    %c0 = arith.constant 0 : index
    %0 = memref.load %arg1[%c0] : memref<1xf32, #tpu.memory_space<smem>>
    %c0_0 = arith.constant 0 : index
    %1 = memref.load %arg2[%c0_0] : memref<1xf32, #tpu.memory_space<smem>>
    %c0_1 = arith.constant 0 : index
    %c0_2 = arith.constant 0 : index
    %2 = vector.load %arg3[%c0_1, %c0_2] : memref<2x1024xf32, #tpu.memory_space<vmem>>, vector<2x1024xf32>
    %3 = vector.broadcast %0 : f32 to vector<2x1024xf32>
    %4 = arith.mulf %3, %2 : vector<2x1024xf32>
    %5 = vector.broadcast %1 : f32 to vector<2x1024xf32>
    %6 = arith.addf %4, %5 : vector<2x1024xf32>
    %c0_3 = arith.constant 0 : index
    %c0_4 = arith.constant 0 : index
    %7 = vector.load %arg4[%c0_3, %c0_4] : memref<2x1024xf32, #tpu.memory_space<vmem>>, vector<2x1024xf32>
    tpu.vector_store %arg4[%c0_3, %c0_4], %6 {strides = array<i32>} : memref<2x1024xf32, #tpu.memory_space<vmem>>, vector<2x1024xf32>,
    return
  }
  func.func @transform_0(%arg0: i32) -> i32 {
    %c0_i32 = arith.constant 0 : i32
    %c0_i32_0 = arith.constant 0 : i32
    return %c0_i32 : i32
  }
  func.func @transform_1(%arg0: i32) -> i32 {
    %c0_i32 = arith.constant 0 : i32
    %c0_i32_0 = arith.constant 0 : i32
    return %c0_i32 : i32
  }
  func.func @transform_2(%arg0: i32) -> (i32, i32) {
    %c0_i32 = arith.constant 0 : i32
    %c0_i32_0 = arith.constant 0 : i32
    return %arg0, %c0_i32 : i32, i32
  }
  func.func @transform_3(%arg0: i32) -> (i32, i32) {
    %c0_i32 = arith.constant 0 : i32
    %c0_i32_0 = arith.constant 0 : i32
    return %arg0, %c0_i32 : i32, i32
  }
}

</mosaic_0001>

<bundles_post_ra>
// kernel: tpu_custom_call.1
= control target key start
LH: loop header
LB: loop body
LE: loop exit
PB: predicated region body
PF: predicated region fallthrough
CT: control target
= control target key end

     0   :  { %10 = vsyncpa [#allocation5], 0  ;;  %s136_s0 = inlined_call_operand.<no memory space> [shape: f32[1], index: 0, kind: input, shape index: {}]   ;;  %s137_s1 = inlined_call_operand.<no memory space> [shape: f32[1], index: 1, kind: input, shape index: {}]   ;;  %s138_s2 = inlined_call_operand.hbm [shape: f32[2,1024], index: 2, kind: input, shape index: {}]   ;;  %s139_s3 = inlined_call_operand.hbm [shape: f32[2,1024], index: 3, kind: output, shape index: {}]  }
   0x1   :  { %11 = vsyncpa [#allocation6], 0  ;;  %s102_s12 = smov [#allocation4]  }
   0x2   :  { %s22_s13 = sshll.u32 %s102_s12, 4  ;;  %s23_s13 = int_to_ptr.vmem [resolvable:$true] %s22_s13 }
   0x3   :  { %s66_s14 = scalar_lea.vmem %s23_s13, 256  ;;  %p71_p1 = scmp.lt.s32.totalorder %s23_s13, %s23_s13 }
   0x4   :  { %p67_p0 = scmp.ne.s32.totalorder %s23_s13, %s66_s14  ;;  %p72_p2 = scmp.lt.s32.totalorder %s66_s14, %s66_s14 }
   0x6   :  { %p73_p3 = por %p72_p2, %p71_p1 }
   0x8   :  { %p74_p4 = pnand %p73_p3, %p67_p0 }
   0xa   :  { %77 = shalt.err (!%p74_p4)
}
   0xb   :  { %25 = dma.hbm_to_vmem [thread:$0]  %s138_s2, 256, %s23_s13, [#allocation5]  }
   0xc   :  { %98 = dma.done.wait [#allocation5], 256  }
   0xd   :  { %99 = vsyncadd [#allocation5], 4294967040  ;;  %v33_v0 = vstv %s136_s0  ;;  %v31_v1 = vld [vmem:[#allocation4] sm:$0xff]  ;;  %v36_v2 = vstv %s137_s1  ;;  %v32_v3 = vld [vmem:[#allocation4 + $0x8] sm:$0xff]  ;;  %s103_s21 = smov [#allocation7]  }
   0xe   :  { %s47_s22 = sshll.u32 %s103_s21, 4  ;;  %v34_v4 = vmul.f32 %v33_v0, %v31_v1  ;;  %v35_v5 = vmul.f32 %v33_v0, %v32_v3  ;;  %s48_s22 = int_to_ptr.vmem [resolvable:$true] %s47_s22 }
   0xf   :  { %s78_s2 = scalar_lea.vmem %s48_s22, 256  ;;  %p83_p6 = scmp.lt.s32.totalorder %s48_s22, %s48_s22 }
  0x10   :  { %v37_v6 = vadd.f32 %v36_v2, %v34_v4  ;;  %v38_v7 = vadd.f32 %v36_v2, %v35_v5  ;;  %p79_p5 = scmp.ne.s32.totalorder %s48_s22, %s78_s2  ;;  %p84_p7 = scmp.lt.s32.totalorder %s78_s2, %s78_s2 }
  0x12   :  { %39 = vst [vmem:[#allocation7] sm:$0xff] %v37_v6  ;;  %40 = vst [vmem:[#allocation7 + $0x8] sm:$0xff] %v38_v7  ;;  %p85_p8 = por %p84_p7, %p83_p6 }
  0x14   :  { %p86_p9 = pnand %p85_p8, %p79_p5 }
  0x16   :  { %89 = shalt.err (!%p86_p9)
}
  0x17   :  { %50 = dma.vmem_to_hbm [thread:$0]  %s48_s22, 256, %s139_s3, [#allocation6]  }
  0x18   :  { %100 = dma.done.wait [#allocation6], 256  }
  0x19   :  { %101 = vsyncadd [#allocation6], 4294967040 }
  0x1a   :  { %54 = vsyncpa [#allocation5], 1 }
  0x1b   :  { %55 = vsyncpa [#allocation6], 1 }

</bundles_post_ra>
